<compile_context>
chip_gen: v7x
topology: tpu7x:2x2x1
jax: 0.10.0
libtpu: 0.0.40
codegen_flags: <defaults>
</compile_context>

<pallas_src>
import jax
import jax.numpy as jnp
from jax.experimental import pallas as pl
from jax.experimental.pallas import tpu as pltpu

_TILE_B_CAP = 1024   # max batch rows per grid step (keeps f32 temporaries ~6.5 MiB)
_ROW_ALIGN = 128     # batch-tile alignment (review fallback: tile_b multiple of 128)


def _qnet_kernel(x_ref, w1_ref, w2_ref, b2_ref, w3_ref, b3_ref, o_ref):
    # x_ref : (tile_b, K1) bf16, K1 = 2S+2A+1, last column == 1 (folds b1)
    # w1_ref: (K1, 512)    bf16, last row == b1
    # w2_ref: (512, 256)   bf16
    # b2_ref: (1, 256) f32 ; w3_ref: (1, 256) f32 ; b3_ref: (1, 1) f32
    # Layer 1: single fused MXU contraction (bias already folded in).
    h1 = jnp.dot(x_ref[...], w1_ref[...], preferred_element_type=jnp.float32)
    h1 = jnp.maximum(h1, 0.0)                                      # f32 ReLU on VPU
    # Layer 2: K=512 is exactly at the K-pass boundary -> keep bias as a VPU add.
    h2 = jnp.dot(h1.astype(jnp.bfloat16), w2_ref[...],
                 preferred_element_type=jnp.float32) + b2_ref[...]
    h2 = jnp.maximum(h2, 0.0)
    # Output layer (out_features=1): VPU multiply + lane reduction (XLU has
    # slack) instead of a 1-wide MXU matmul padded to a full column tile.
    q = jnp.sum(h2 * w3_ref[...], axis=-1, keepdims=True) + b3_ref[...]
    o_ref[...] = q.astype(o_ref.dtype)


def _choose_tiling(batch):
    """Balanced, 128-aligned batch tiles; >= 2 (even) grid steps when splittable."""
    num_tiles = -(-batch // _TILE_B_CAP)            # cdiv
    if batch >= 2 * _ROW_ALIGN:
        num_tiles = max(num_tiles, 2)               # keep both v7x TensorCores busy
    if num_tiles > 1 and num_tiles % 2:
        num_tiles += 1                              # even step count for 2 TCs
    tile_b = -(-batch // num_tiles)
    tile_b = -(-tile_b // _ROW_ALIGN) * _ROW_ALIGN
    return tile_b, num_tiles


@jax.jit
def q_network_forward(states, actions, params):
    """states: (B, 2*state_size) f32, actions: (B, 2*action_size) f32 -> (B, 1) f32."""
    B = states.shape[0]
    tile_b, num_tiles = _choose_tiling(B)
    b_pad = tile_b * num_tiles

    # Fused layer-1 operand: [states | actions | 1]; the ones column folds b1
    # into W1 so layer 1 is a single K=2S+2A+1 MXU pass with no separate bias add.
    x = jnp.concatenate([states, actions, jnp.ones((B, 1), states.dtype)], axis=1)
    if b_pad != B:
        x = jnp.pad(x, ((0, b_pad - B), (0, 0)))    # padded rows are all-zero
    x = x.astype(jnp.bfloat16)
    k1 = x.shape[1]

    row = lambda i: (i, 0)       # batch-tiled operands
    const = lambda i: (0, 0)     # weights/biases: same block every step -> stay resident

    out = pl.pallas_call(
        _qnet_kernel,
        out_shape=jax.ShapeDtypeStruct((b_pad, 1), jnp.float32),
        grid=(num_tiles,),
        in_specs=[
            pl.BlockSpec((tile_b, k1), row),
            pl.BlockSpec(params["w1"].shape, const),
            pl.BlockSpec(params["w2"].shape, const),
            pl.BlockSpec(params["b2"].shape, const),
            pl.BlockSpec(params["w3"].shape, const),
            pl.BlockSpec(params["b3"].shape, const),
        ],
        out_specs=pl.BlockSpec((tile_b, 1), row),
        compiler_params=pltpu.CompilerParams(
            dimension_semantics=("parallel",),
            vmem_limit_bytes=32 << 20,   # v5e default scoped VMEM is only 16 MiB
        ),
    )(x, params["w1"], params["w2"], params["b2"], params["w3"], params["b3"])
    return out[:B]


def init_params(key, state_size, action_size, hidden_layer_sizes=(512, 256)):
    """Mirrors the PyTorch module's reset_parameters().

    nn.Linear weight is (out, in); we store the transpose (in, out) and fold b1
    into W1 as an extra row (paired with the ones column appended to the input).
    Hidden-layer weights ~ U(-1/sqrt(out), 1/sqrt(out)) (hidden_init uses
    weight.size()[0] == out_features); output weight ~ U(-3e-3, 3e-3);
    biases keep the nn.Linear default U(-1/sqrt(in), 1/sqrt(in)).
    MXU weights are stored in bf16.
    """
    in_dim = 2 * (state_size + action_size)
    h1, h2 = hidden_layer_sizes
    ks = jax.random.split(key, 6)

    def u(k, shape, lim):
        return jax.random.uniform(k, shape, jnp.float32, -lim, lim)

    w1 = u(ks[0], (in_dim, h1), 1.0 / h1 ** 0.5)
    b1 = u(ks[1], (1, h1), 1.0 / in_dim ** 0.5)
    params = {
        "w1": jnp.concatenate([w1, b1], axis=0).astype(jnp.bfloat16),  # (in_dim+1, 512)
        "w2": u(ks[2], (h1, h2), 1.0 / h2 ** 0.5).astype(jnp.bfloat16),
        "b2": u(ks[3], (1, h2), 1.0 / h1 ** 0.5),
        "w3": u(ks[4], (1, h2), 3e-3),          # (1, 256) row for the VPU reduce
        "b3": u(ks[5], (1, 1), 1.0 / h2 ** 0.5),
    }
    return params


def _reference_forward(states, actions, params):
    """Pure-JAX reference reproducing the kernel's bf16 rounding."""
    hp = jax.lax.Precision.HIGHEST
    B = states.shape[0]
    x = jnp.concatenate([states, actions, jnp.ones((B, 1), states.dtype)], axis=1)
    x = x.astype(jnp.bfloat16).astype(jnp.float32)
    w1 = params["w1"].astype(jnp.float32)    # b1 folded in as the last row
    w2 = params["w2"].astype(jnp.float32)
    h1 = jnp.maximum(jnp.dot(x, w1, precision=hp), 0.0)
    h1 = h1.astype(jnp.bfloat16).astype(jnp.float32)
    h2 = jnp.maximum(jnp.dot(h1, w2, precision=hp) + params["b2"], 0.0)
    return jnp.sum(h2 * params["w3"], axis=-1, keepdims=True) + params["b3"]


if __name__ == "__main__":
    # Small, module-consistent shapes: 2 agents -> states (B, 2*S), actions (B, 2*A).
    state_size = 8
    action_size = 4
    batch = 8

    key = jax.random.PRNGKey(0)
    k_params, k_s, k_a = jax.random.split(key, 3)

    params = init_params(k_params, state_size, action_size)
    states = jax.random.normal(k_s, (batch, state_size * 2), jnp.float32)
    actions = jax.random.normal(k_a, (batch, action_size * 2), jnp.float32)

    q = q_network_forward(states, actions, params)
    q = jax.block_until_ready(q)

    q_ref = _reference_forward(states, actions, params)
    assert q.shape == (batch, 1), q.shape
    assert jnp.allclose(q, q_ref, atol=2e-3, rtol=2e-3), (q, q_ref)

    print("KERNEL_OK")
</pallas_src>

<mosaic_0001>
module attributes {stable_mosaic.version = 11 : i64} {
  func.func @_qnet_kernel(%arg0: i32, %arg1: memref<128x25xbf16, #tpu.memory_space<vmem>>, %arg2: memref<25x512xbf16, #tpu.memory_space<vmem>>, %arg3: memref<512x256xbf16, #tpu.memory_space<vmem>>, %arg4: memref<1x256xf32, #tpu.memory_space<vmem>>, %arg5: memref<1x256xf32, #tpu.memory_space<vmem>>, %arg6: memref<1x1xf32, #tpu.memory_space<vmem>>, %arg7: memref<128x1xf32, #tpu.memory_space<vmem>>) attributes {dimension_semantics = [#tpu.dimension_semantics<parallel>], iteration_bounds = array<i64: 1>, scalar_prefetch = 0 : i64, scratch_operands = 0 : i64, tpu.core_type = #tpu.core_type<tc>, window_params = [{transform_indices = @transform_0, window_bounds = array<i64: 128, 25>}, {pipeline_mode = #tpu.pipeline_mode<synchronous>, transform_indices = @transform_1, window_bounds = array<i64: 25, 512>}, {pipeline_mode = #tpu.pipeline_mode<synchronous>, transform_indices = @transform_2, window_bounds = array<i64: 512, 256>}, {pipeline_mode = #tpu.pipeline_mode<synchronous>, transform_indices = @transform_3, window_bounds = array<i64: 1, 256>}, {pipeline_mode = #tpu.pipeline_mode<synchronous>, transform_indices = @transform_4, window_bounds = array<i64: 1, 256>}, {pipeline_mode = #tpu.pipeline_mode<synchronous>, transform_indices = @transform_5, window_bounds = array<i64: 1, 1>}, {transform_indices = @transform_6, window_bounds = array<i64: 128, 1>}]} {
    %c0 = arith.constant 0 : index
    %c0_0 = arith.constant 0 : index
    %0 = vector.load %arg1[%c0, %c0_0] : memref<128x25xbf16, #tpu.memory_space<vmem>>, vector<128x25xbf16>
    %c0_1 = arith.constant 0 : index
    %c0_2 = arith.constant 0 : index
    %1 = vector.load %arg2[%c0_1, %c0_2] : memref<25x512xbf16, #tpu.memory_space<vmem>>, vector<25x512xbf16>
    %cst = arith.constant dense<0.000000e+00> : vector<128x512xf32>
    %2 = tpu.matmul %0, %1, %cst {dimension_numbers = #tpu.dot_dimension_numbers<[1], [0], [0], [1], [0, 0, 1, 1], [], []>} : vector<128x25xbf16>, vector<25x512xbf16>, vector<128x512xf32> -> vector<128x512xf32>
    %cst_3 = arith.constant 0.000000e+00 : f32
    %3 = vector.broadcast %cst_3 : f32 to vector<128x512xf32>
    %4 = arith.maximumf %2, %3 : vector<128x512xf32>
    %5 = arith.truncf %4 : vector<128x512xf32> to vector<128x512xbf16>
    %c0_4 = arith.constant 0 : index
    %c0_5 = arith.constant 0 : index
    %6 = vector.load %arg3[%c0_4, %c0_5] : memref<512x256xbf16, #tpu.memory_space<vmem>>, vector<512x256xbf16>
    %cst_6 = arith.constant dense<0.000000e+00> : vector<128x256xf32>
    %7 = tpu.matmul %5, %6, %cst_6 {dimension_numbers = #tpu.dot_dimension_numbers<[1], [0], [0], [1], [0, 0, 1, 1], [], []>} : vector<128x512xbf16>, vector<512x256xbf16>, vector<128x256xf32> -> vector<128x256xf32>
    %c0_7 = arith.constant 0 : index
    %c0_8 = arith.constant 0 : index
    %8 = vector.load %arg4[%c0_7, %c0_8] : memref<1x256xf32, #tpu.memory_space<vmem>>, vector<1x256xf32>
    %9 = vector.broadcast %8 : vector<1x256xf32> to vector<128x256xf32>
    %10 = arith.addf %7, %9 : vector<128x256xf32>
    %cst_9 = arith.constant 0.000000e+00 : f32
    %11 = vector.broadcast %cst_9 : f32 to vector<128x256xf32>
    %12 = arith.maximumf %10, %11 : vector<128x256xf32>
    %c0_10 = arith.constant 0 : index
    %c0_11 = arith.constant 0 : index
    %13 = vector.load %arg5[%c0_10, %c0_11] : memref<1x256xf32, #tpu.memory_space<vmem>>, vector<1x256xf32>
    %14 = vector.broadcast %13 : vector<1x256xf32> to vector<128x256xf32>
    %15 = arith.mulf %12, %14 : vector<128x256xf32>
    %cst_12 = arith.constant dense<0.000000e+00> : vector<128xf32>
    %16 = vector.multi_reduction <add>, %15, %cst_12 [1] : vector<128x256xf32> to vector<128xf32>
    %17 = vector.shape_cast %16 : vector<128xf32> to vector<128x1xf32>
    %c0_13 = arith.constant 0 : index
    %c0_14 = arith.constant 0 : index
    %18 = vector.load %arg6[%c0_13, %c0_14] : memref<1x1xf32, #tpu.memory_space<vmem>>, vector<1x1xf32>
    %19 = vector.broadcast %18 : vector<1x1xf32> to vector<128x1xf32>
    %20 = arith.addf %17, %19 : vector<128x1xf32>
    %c0_15 = arith.constant 0 : index
    %c0_16 = arith.constant 0 : index
    %21 = vector.load %arg7[%c0_15, %c0_16] : memref<128x1xf32, #tpu.memory_space<vmem>>, vector<128x1xf32>
    tpu.vector_store %arg7[%c0_15, %c0_16], %20 {strides = array<i32>} : memref<128x1xf32, #tpu.memory_space<vmem>>, vector<128x1xf32>,
    return
  }
  func.func @transform_0(%arg0: i32) -> (i32, i32) {
    %c0_i32 = arith.constant 0 : i32
    %c0_i32_0 = arith.constant 0 : i32
    return %arg0, %c0_i32 : i32, i32
  }
  func.func @transform_1(%arg0: i32) -> (i32, i32) {
    %c0_i32 = arith.constant 0 : i32
    %c0_i32_0 = arith.constant 0 : i32
    %c0_i32_1 = arith.constant 0 : i32
    return %c0_i32, %c0_i32_0 : i32, i32
  }
  func.func @transform_2(%arg0: i32) -> (i32, i32) {
    %c0_i32 = arith.constant 0 : i32
    %c0_i32_0 = arith.constant 0 : i32
    %c0_i32_1 = arith.constant 0 : i32
    return %c0_i32, %c0_i32_0 : i32, i32
  }
  func.func @transform_3(%arg0: i32) -> (i32, i32) {
    %c0_i32 = arith.constant 0 : i32
    %c0_i32_0 = arith.constant 0 : i32
    %c0_i32_1 = arith.constant 0 : i32
    return %c0_i32, %c0_i32_0 : i32, i32
  }
  func.func @transform_4(%arg0: i32) -> (i32, i32) {
    %c0_i32 = arith.constant 0 : i32
    %c0_i32_0 = arith.constant 0 : i32
    %c0_i32_1 = arith.constant 0 : i32
    return %c0_i32, %c0_i32_0 : i32, i32
  }
  func.func @transform_5(%arg0: i32) -> (i32, i32) {
    %c0_i32 = arith.constant 0 : i32
    %c0_i32_0 = arith.constant 0 : i32
    %c0_i32_1 = arith.constant 0 : i32
    return %c0_i32, %c0_i32_0 : i32, i32
  }
  func.func @transform_6(%arg0: i32) -> (i32, i32) {
    %c0_i32 = arith.constant 0 : i32
    %c0_i32_0 = arith.constant 0 : i32
    return %arg0, %c0_i32 : i32, i32
  }
}

</mosaic_0001>

<bundles_post_ra>
// kernel: q_network_forward.1
= control target key start
LH: loop header
LB: loop body
LE: loop exit
PB: predicated region body
PF: predicated region fallthrough
CT: control target
= control target key end

     0   :  { %s1877_s0 = inlined_call_operand.vmem [shape: bf16[128,25], index: 0, kind: input, shape index: {}]   ;;  %s1878_s1 = inlined_call_operand.vmem [shape: bf16[25,512], index: 1, kind: input, shape index: {}]   ;;  %s1879_s2 = inlined_call_operand.hbm [shape: bf16[512,256], index: 2, kind: input, shape index: {}]   ;;  %s1880_s3 = inlined_call_operand.vmem [shape: f32[1,256], index: 3, kind: input, shape index: {}]   ;;  %s1881_s4 = inlined_call_operand.vmem [shape: f32[1,256], index: 4, kind: input, shape index: {}]   ;;  %s1882_s5 = inlined_call_operand.<no memory space> [shape: f32[1,1], index: 5, kind: input, shape index: {}]   ;;  %s1883_s6 = inlined_call_operand.vmem [shape: f32[128,1], index: 6, kind: output, shape index: {}]  }
   0x1   :  { %v11_v0 = vstv %s1882_s5 }
   0x2   :  { %12 = vst [vmem:[#allocation2] sm:$0x1] %v11_v0 }
   0x3   :  { %13 = vsyncpa [#allocation4], 0  ;;  %s1600_s23 = smov [#allocation3]   ;;  %s1576_s27 = scalar_lea.hbm %s1879_s2, 8192 }
   0x4   :  { %s23_s24 = sshll.u32 %s1600_s23, 4  ;;  %p1577_p0 = scmp.ne.s32.totalorder %s1879_s2, %s1576_s27  ;;  %s24_s24 = int_to_ptr.vmem [resolvable:$true] %s23_s24 }
   0x5   :  { %p1580_p1 = scmp.lt.u32.totalorder %s1576_s27, %s1879_s2 }
   0x7   :  { %p1582_p2 = pnand %p1580_p1, %p1577_p0 }
   0x9   :  { %1585 = shalt.err (!%p1582_p2)
}
   0xa   :  { %s1586_s5 = scalar_lea.vmem %s24_s24, 8192  ;;  %p1591_p4 = scmp.lt.s32.totalorder %s24_s24, %s24_s24 }
   0xb   :  { %p1587_p3 = scmp.ne.s32.totalorder %s24_s24, %s1586_s5  ;;  %p1592_p5 = scmp.lt.s32.totalorder %s1586_s5, %s1586_s5 }
   0xd   :  { %p1593_p6 = por %p1592_p5, %p1591_p4 }
   0xf   :  { %p1594_p7 = pnand %p1593_p6, %p1587_p3 }
  0x11   :  { %1597 = shalt.err (!%p1594_p7)
}
  0x12   :  { %s1601_s8 = smov 128   ;;  %s1602_s9 = smov 8  }
  0x13   :  { %29 = dma.hbm_to_vmem [thread:$0]  %s1879_s2, 8192, %s24_s24, [#allocation4], %s1601_s8, %s1601_s8, %s1602_s9  }
  0x14   :  { %1598 = dma.done.wait [#allocation4], 8192  }
  0x15   :  { %1599 = vsyncadd [#allocation4], 4294959104  ;;  %v1603_v1 = vmov 0   ;;  %vm165_vm0 = vcmask 1043456   ;;  %vm166_vm1 = vcmask 1044480   ;;  %v1604_v2 = vmov 65535  }
  0x16   :  { %213 = vmatprep.mubr.bf16.mxu0 %v1603_v1  ;;  %326 = vmatprep.mubr.bf16.mxu1 %v1603_v1  ;;  %v167_v3 = vsel %vm165_vm0, 4294967295, %v1604_v2  ;;  %v1460_v4 = vld [vmem:[%s1878_s1 + $0x4] ss:$16 sps:$4 sm:$0xff]   ;;  %v1462_v5 = vld [vmem:[%s1878_s1 + $0xc] ss:$16 sps:$4 sm:$0xff]   ;;  %vm140_vm2 = vcmask 203776  }
  0x17   :  { %181 = vmatprep.subr.bf16.mxu0 %v1460_v4  ;;  %v1464_v6 = vld [vmem:[%s1878_s1] ss:$16 sps:$4 sm:$0xff]   ;;  %v1465_v7 = vld [vmem:[%s1878_s1 + $0x8] ss:$16 sps:$4 sm:$0xff]   ;;  %v168_v8 = vsel %vm166_vm1, %v167_v3, 0  ;;  %294 = vmatprep.subr.bf16.mxu1 %v1462_v5  ;;  %vm1272_vm3 = vcmask 7168  }
  0x18   :  { %v1466_v9 = vld [vmem:[%s1878_s1 + $0x24] ss:$16 sps:$4 sm:$0x1f]   ;;  %182 = vmatpush1.bf16.msra.mxu0 %v1464_v6  ;;  %295 = vmatpush1.bf16.msra.mxu1 %v1465_v7  ;;  %v1468_v10 = vld [vmem:[%s1878_s1 + $0x2c] ss:$16 sps:$4 sm:$0x1f]  }
  0x19   :  { %v173_v11 = vand.u32 %v1466_v9, %v168_v8  ;;  %v1470_v12 = vld [vmem:[%s1878_s1 + $0x20] ss:$16 sps:$4 sm:$0x1f]   ;;  %v1471_v13 = vld [vmem:[%s1878_s1 + $0x28] ss:$16 sps:$4 sm:$0x1f]   ;;  %v179_v14 = vand.u32 %v1468_v10, %v168_v8 }
  0x1a   :  { %v170_v15 = vand.u32 %v1470_v12, %v168_v8  ;;  %v176_v16 = vand.u32 %v1471_v13, %v168_v8  ;;  %v1472_v17 = vld [vmem:[%s1877_s0] sm:$0xff]   ;;  %v1473_v18 = vld [vmem:[%s1877_s0 + $0x8] sm:$0xff]   ;;  %v1486_v24 = vld [vmem:[#allocation3 + $0x10] ss:$8 sps:$4 sm:$0xff]  }
  0x1b   :  { %183 = vmatprep.subr.bf16.mxu0 %v173_v11  ;;  %296 = vmatprep.subr.bf16.mxu1 %v179_v14  ;;  %v1480_v19 = vld [vmem:[#allocation3] ss:$8 sps:$4 sm:$0xff]   ;;  %v1482_v20 = vld [vmem:[#allocation3 + $0x4] ss:$8 sps:$4 sm:$0xff]   ;;  %v1488_v23 = vld [vmem:[#allocation3 + $0x14] ss:$8 sps:$4 sm:$0xff]  }
  0x1c   :  { %184 = vmatpush1.bf16.msra.mxu0 %v170_v15  ;;  %297 = vmatpush1.bf16.msra.mxu1 %v176_v16  ;;  %v1483_v21 = vld [vmem:[#allocation3 + $0x100] ss:$8 sps:$4 sm:$0xff]   ;;  %v1485_v22 = vld [vmem:[#allocation3 + $0x104] ss:$8 sps:$4 sm:$0xff]   ;;  %v1491_v25 = vld [vmem:[#allocation3 + $0x114] ss:$8 sps:$4 sm:$0xff]  }
  0x1d   :  { %899 = vmatprep.subr.bf16.mxu1 %v1482_v20  ;;  %1012 = vmatprep.subr.bf16.mxu0 %v1485_v22  ;;  %v1489_v26 = vld [vmem:[#allocation3 + $0x110] ss:$8 sps:$4 sm:$0xff]   ;;  %v1494_v27 = vld [vmem:[#allocation3 + $0x24] ss:$8 sps:$4 sm:$0xff]   ;;  %v1492_v29 = vld [vmem:[#allocation3 + $0x20] ss:$8 sps:$4 sm:$0xff]  }
  0x1e   :  { %v1497_v28 = vld [vmem:[#allocation3 + $0x124] ss:$8 sps:$4 sm:$0xff]   ;;  %v1495_v30 = vld [vmem:[#allocation3 + $0x120] ss:$8 sps:$4 sm:$0xff]   ;;  %v1500_v31 = vld [vmem:[#allocation3 + $0x34] ss:$8 sps:$4 sm:$0xff]  }
  0x1f   :  { %1310 = vmatmul.mubr.msk.bf16.vlgmr.msra.gmra.mrb[0].mxu0 %vm140_vm2, %v1472_v17  ;;  %1318 = vmatmul.mubr.msk.bf16.vlgmr.msra.gmra.mrb[0].mxu1 %vm140_vm2, %v1472_v17  ;;  %v1474_v32 = vld [vmem:[%s1877_s0 + $0x10] sm:$0xff]   ;;  %v1504_v38 = vld [vmem:[#allocation3 + $0x40] ss:$8 sps:$4 sm:$0xff]   ;;  %v1475_v41 = vld [vmem:[%s1877_s0 + $0x18] sm:$0xff]  }
  0x20   :  { %223 = vmatprep.mubr.bf16.mxu0 %v1603_v1  ;;  %336 = vmatprep.mubr.bf16.mxu1 %v1603_v1  ;;  %v1498_v33 = vld [vmem:[#allocation3 + $0x30] ss:$8 sps:$4 sm:$0xff]   ;;  %v1503_v35 = vld [vmem:[#allocation3 + $0x134] ss:$8 sps:$4 sm:$0xff]   ;;  %v1506_v36 = vld [vmem:[#allocation3 + $0x44] ss:$8 sps:$4 sm:$0xff]  }
  0x21   :  { %900 = vmatpush1.bf16.msra.mxu1 %v1480_v19  ;;  %1013 = vmatpush1.bf16.msra.mxu0 %v1483_v21  ;;  %v1501_v34 = vld [vmem:[#allocation3 + $0x130] ss:$8 sps:$4 sm:$0xff]   ;;  %v1509_v37 = vld [vmem:[#allocation3 + $0x144] ss:$8 sps:$4 sm:$0xff]   ;;  %v1507_v39 = vld [vmem:[#allocation3 + $0x140] ss:$8 sps:$4 sm:$0xff]  }
  0x22   :  { %901 = vmatprep.subr.bf16.mxu1 %v1488_v23  ;;  %1014 = vmatprep.subr.bf16.mxu0 %v1491_v25  ;;  %v1512_v40 = vld [vmem:[#allocation3 + $0x54] ss:$8 sps:$4 sm:$0xff]   ;;  %v1510_v42 = vld [vmem:[#allocation3 + $0x50] ss:$8 sps:$4 sm:$0xff]   ;;  %v1518_v45 = vld [vmem:[#allocation3 + $0x64] ss:$8 sps:$4 sm:$0xff]  }
  0x23   :  { %v1513_v43 = vld [vmem:[#allocation3 + $0x150] ss:$8 sps:$4 sm:$0xff]   ;;  %v1515_v44 = vld [vmem:[#allocation3 + $0x154] ss:$8 sps:$4 sm:$0xff]   ;;  %v1521_v46 = vld [vmem:[#allocation3 + $0x164] ss:$8 sps:$4 sm:$0xff]  }
  0x24   :  { %v1516_v47 = vld [vmem:[#allocation3 + $0x60] ss:$8 sps:$4 sm:$0xff]   ;;  %v1524_v49 = vld [vmem:[#allocation3 + $0x74] ss:$8 sps:$4 sm:$0xff]   ;;  %v1522_v51 = vld [vmem:[#allocation3 + $0x70] ss:$8 sps:$4 sm:$0xff]  }
  0x25   :  { %902 = vmatpush1.bf16.msra.mxu1 %v1486_v24  ;;  %1015 = vmatpush1.bf16.msra.mxu0 %v1489_v26  ;;  %v1519_v48 = vld [vmem:[#allocation3 + $0x160] ss:$8 sps:$4 sm:$0xff]   ;;  %v1525_v52 = vld [vmem:[#allocation3 + $0x170] ss:$8 sps:$4 sm:$0xff]   ;;  %v1527_v53 = vld [vmem:[#allocation3 + $0x174] ss:$8 sps:$4 sm:$0xff]  }
  0x26   :  { %903 = vmatprep.subr.bf16.mxu1 %v1494_v27  ;;  %1016 = vmatprep.subr.bf16.mxu0 %v1497_v28  ;;  %v1476_v50 = vld [vmem:[%s1877_s0 + $0x20] sm:$0xff]   ;;  %v1477_v56 = vld [vmem:[%s1877_s0 + $0x28] sm:$0xff]   ;;  %v1534_v60 = vld [vmem:[#allocation3 + $0x90] ss:$8 sps:$4 sm:$0xff]  }
  0x27   :  { %1311 = vmatmul.mubr.msk.bf16.gmra.mrb[4].mxu0 %vm140_vm2, %v1473_v18  ;;  %1319 = vmatmul.mubr.msk.bf16.gmra.mrb[4].mxu1 %vm140_vm2, %v1473_v18  ;;  %v1530_v54 = vld [vmem:[#allocation3 + $0x84] ss:$8 sps:$4 sm:$0xff]   ;;  %v1528_v57 = vld [vmem:[#allocation3 + $0x80] ss:$8 sps:$4 sm:$0xff]   ;;  %v1536_v59 = vld [vmem:[#allocation3 + $0x94] ss:$8 sps:$4 sm:$0xff]  }
  0x28   :  { %233 = vmatprep.mubr.bf16.mxu0 %v1603_v1  ;;  %346 = vmatprep.mubr.bf16.mxu1 %v1603_v1  ;;  %v1533_v55 = vld [vmem:[#allocation3 + $0x184] ss:$8 sps:$4 sm:$0xff]   ;;  %v1531_v58 = vld [vmem:[#allocation3 + $0x180] ss:$8 sps:$4 sm:$0xff]   ;;  %v1537_v61 = vld [vmem:[#allocation3 + $0x190] ss:$8 sps:$4 sm:$0xff]  }
  0x29   :  { %904 = vmatpush1.bf16.msra.mxu1 %v1492_v29  ;;  %1017 = vmatpush1.bf16.msra.mxu0 %v1495_v30  ;;  %v1539_v62 = vld [vmem:[#allocation3 + $0x194] ss:$8 sps:$4 sm:$0xff]   ;;  %v1542_v63 = vld [vmem:[#allocation3 + $0xa4] ss:$8 sps:$4 sm:$0xff]   ;;  %v1540_v2 = vld [vmem:[#allocation3 + $0xa0] ss:$8 sps:$4 sm:$0xff]  }
  0x2a   :  { %905 = vmatprep.subr.bf16.mxu1 %v1500_v31  ;;  %1018 = vmatprep.subr.bf16.mxu0 %v1503_v35  ;;  %v1545_v0 = vld [vmem:[#allocation3 + $0x1a4] ss:$8 sps:$4 sm:$0xff]   ;;  %v1543_v3 = vld [vmem:[#allocation3 + $0x1a0] ss:$8 sps:$4 sm:$0xff]   ;;  %v1548_v4 = vld [vmem:[#allocation3 + $0xb4] ss:$8 sps:$4 sm:$0xff]  }
  0x2b   :  { %v1478_v5 = vld [vmem:[%s1877_s0 + $0x30] sm:$0xff]   ;;  %v1552_v11 = vld [vmem:[#allocation3 + $0xc0] ss:$8 sps:$4 sm:$0xff]   ;;  %v1479_v14 = vld [vmem:[%s1877_s0 + $0x38] sm:$0xff]  }
  0x2c   :  { %v1546_v6 = vld [vmem:[#allocation3 + $0xb0] ss:$8 sps:$4 sm:$0xff]   ;;  %v1551_v7 = vld [vmem:[#allocation3 + $0x1b4] ss:$8 sps:$4 sm:$0xff]   ;;  %v1554_v9 = vld [vmem:[#allocation3 + $0xc4] ss:$8 sps:$4 sm:$0xff]  }
  0x2d   :  { %906 = vmatpush1.bf16.msra.mxu1 %v1498_v33  ;;  %1019 = vmatpush1.bf16.msra.mxu0 %v1501_v34  ;;  %v1549_v8 = vld [vmem:[#allocation3 + $0x1b0] ss:$8 sps:$4 sm:$0xff]   ;;  %v1557_v10 = vld [vmem:[#allocation3 + $0x1c4] ss:$8 sps:$4 sm:$0xff]   ;;  %v1555_v12 = vld [vmem:[#allocation3 + $0x1c0] ss:$8 sps:$4 sm:$0xff]  }
  0x2e   :  { %907 = vmatprep.subr.bf16.mxu1 %v1506_v36  ;;  %1020 = vmatprep.subr.bf16.mxu0 %v1509_v37  ;;  %v1560_v13 = vld [vmem:[#allocation3 + $0xd4] ss:$8 sps:$4 sm:$0xff]   ;;  %v1558_v16 = vld [vmem:[#allocation3 + $0xd0] ss:$8 sps:$4 sm:$0xff]   ;;  %v1569_v18 = vld [vmem:[#allocation3 + $0x1e4] ss:$8 sps:$4 sm:$0xff]  }
  0x2f   :  { %1312 = vmatmul.mubr.msk.bf16.gmra.mrb[8].mxu0 %vm140_vm2, %v1474_v32  ;;  %1320 = vmatmul.mubr.msk.bf16.gmra.mrb[8].mxu1 %vm140_vm2, %v1474_v32  ;;  %v1563_v15 = vld [vmem:[#allocation3 + $0x1d4] ss:$8 sps:$4 sm:$0xff]   ;;  %v1561_v17 = vld [vmem:[#allocation3 + $0x1d0] ss:$8 sps:$4 sm:$0xff]   ;;  %v1564_v19 = vld [vmem:[#allocation3 + $0xe0] ss:$8 sps:$4 sm:$0xff]  }
  0x30   :  { %243 = vmatprep.mubr.bf16.mxu0 %v1603_v1  ;;  %356 = vmatprep.mubr.bf16.mxu1 %v1603_v1  ;;  %v1567_v20 = vld [vmem:[#allocation3 + $0x1e0] ss:$8 sps:$4 sm:$0xff]   ;;  %v1572_v21 = vld [vmem:[#allocation3 + $0xf4] ss:$8 sps:$4 sm:$0xff]   ;;  %v1570_v23 = vld [vmem:[#allocation3 + $0xf0] ss:$8 sps:$4 sm:$0xff]  }
  0x31   :  { %908 = vmatpush1.bf16.msra.mxu1 %v1504_v38  ;;  %1021 = vmatpush1.bf16.msra.mxu0 %v1507_v39  ;;  %v1575_v22 = vld [vmem:[#allocation3 + $0x1f4] ss:$8 sps:$4 sm:$0xff]   ;;  %v1573_v24 = vld [vmem:[#allocation3 + $0x1f0] ss:$8 sps:$4 sm:$0xff]  }
  0x32   :  { %909 = vmatprep.subr.bf16.mxu1 %v1512_v40  ;;  %1022 = vmatprep.subr.bf16.mxu0 %v1515_v44 }
  0x35   :  { %910 = vmatpush1.bf16.msra.mxu1 %v1510_v42  ;;  %1023 = vmatpush1.bf16.msra.mxu0 %v1513_v43 }
  0x36   :  { %911 = vmatprep.subr.bf16.mxu1 %v1518_v45  ;;  %1024 = vmatprep.subr.bf16.mxu0 %v1521_v46 }
  0x37   :  { %1313 = vmatmul.mubr.msk.bf16.gmra.mrb[12].mxu0 %vm140_vm2, %v1475_v41  ;;  %1321 = vmatmul.mubr.msk.bf16.gmra.mrb[12].mxu1 %vm140_vm2, %v1475_v41 }
  0x38   :  { %253 = vmatprep.mubr.bf16.mxu0 %v1603_v1  ;;  %366 = vmatprep.mubr.bf16.mxu1 %v1603_v1 }
  0x39   :  { %912 = vmatpush1.bf16.msra.mxu1 %v1516_v47  ;;  %1025 = vmatpush1.bf16.msra.mxu0 %v1519_v48 }
  0x3a   :  { %913 = vmatprep.subr.bf16.mxu1 %v1524_v49  ;;  %1026 = vmatprep.subr.bf16.mxu0 %v1527_v53 }
  0x3d   :  { %914 = vmatpush1.bf16.msra.mxu1 %v1522_v51  ;;  %1027 = vmatpush1.bf16.msra.mxu0 %v1525_v52 }
  0x3e   :  { %915 = vmatprep.subr.bf16.mxu1 %v1530_v54  ;;  %1028 = vmatprep.subr.bf16.mxu0 %v1533_v55 }
  0x3f   :  { %1314 = vmatmul.mubr.msk.bf16.gmra.mrb[16].mxu0 %vm140_vm2, %v1476_v50  ;;  %1322 = vmatmul.mubr.msk.bf16.gmra.mrb[16].mxu1 %vm140_vm2, %v1476_v50 }
  0x40   :  { %263 = vmatprep.mubr.bf16.mxu0 %v1603_v1  ;;  %376 = vmatprep.mubr.bf16.mxu1 %v1603_v1 }
  0x41   :  { %916 = vmatpush1.bf16.msra.mxu1 %v1528_v57  ;;  %1029 = vmatpush1.bf16.msra.mxu0 %v1531_v58 }
  0x42   :  { %917 = vmatprep.subr.bf16.mxu1 %v1536_v59  ;;  %1030 = vmatprep.subr.bf16.mxu0 %v1539_v62 }
  0x45   :  { %918 = vmatpush1.bf16.msra.mxu1 %v1534_v60  ;;  %1031 = vmatpush1.bf16.msra.mxu0 %v1537_v61 }
  0x46   :  { %919 = vmatprep.subr.bf16.mxu1 %v1542_v63  ;;  %1032 = vmatprep.subr.bf16.mxu0 %v1545_v0 }
  0x47   :  { %1315 = vmatmul.mubr.msk.bf16.gmra.mrb[20].mxu0 %vm140_vm2, %v1477_v56  ;;  %1323 = vmatmul.mubr.msk.bf16.gmra.mrb[20].mxu1 %vm140_vm2, %v1477_v56 }
  0x48   :  { %273 = vmatprep.mubr.bf16.mxu0 %v1603_v1  ;;  %386 = vmatprep.mubr.bf16.mxu1 %v1603_v1 }
  0x49   :  { %920 = vmatpush1.bf16.msra.mxu1 %v1540_v2  ;;  %1033 = vmatpush1.bf16.msra.mxu0 %v1543_v3 }
  0x4a   :  { %921 = vmatprep.subr.bf16.mxu1 %v1548_v4  ;;  %1034 = vmatprep.subr.bf16.mxu0 %v1551_v7 }
  0x4d   :  { %922 = vmatpush1.bf16.msra.mxu1 %v1546_v6  ;;  %1035 = vmatpush1.bf16.msra.mxu0 %v1549_v8 }
  0x4e   :  { %923 = vmatprep.subr.bf16.mxu1 %v1554_v9  ;;  %1036 = vmatprep.subr.bf16.mxu0 %v1557_v10 }
  0x4f   :  { %1316 = vmatmul.mubr.msk.bf16.gmra.mrb[24].mxu0 %vm140_vm2, %v1478_v5  ;;  %1324 = vmatmul.mubr.msk.bf16.gmra.mrb[24].mxu1 %vm140_vm2, %v1478_v5 }
  0x50   :  { %283 = vmatprep.mubr.bf16.mxu0 %v1603_v1  ;;  %396 = vmatprep.mubr.bf16.mxu1 %v1603_v1  ;;  %v1566_v1 = vld [vmem:[#allocation3 + $0xe4] ss:$8 sps:$4 sm:$0xff]  }
  0x51   :  { %924 = vmatpush1.bf16.msra.mxu1 %v1552_v11  ;;  %1037 = vmatpush1.bf16.msra.mxu0 %v1555_v12 }
  0x52   :  { %925 = vmatprep.subr.bf16.mxu1 %v1560_v13  ;;  %1038 = vmatprep.subr.bf16.mxu0 %v1563_v15 }
  0x55   :  { %926 = vmatpush1.bf16.msra.mxu1 %v1558_v16  ;;  %1039 = vmatpush1.bf16.msra.mxu0 %v1561_v17 }
  0x56   :  { %927 = vmatprep.subr.bf16.mxu1 %v1566_v1  ;;  %1040 = vmatprep.subr.bf16.mxu0 %v1569_v18 }
  0x57   :  { %1317 = vmatmul.mubr.msk.bf16.gmra.mrb[28].mxu0 %vm140_vm2, %v1479_v14  ;;  %1325 = vmatmul.mubr.msk.bf16.gmra.mrb[28].mxu1 %vm140_vm2, %v1479_v14 }
  0x59   :  { %928 = vmatpush1.bf16.msra.mxu1 %v1564_v19  ;;  %1041 = vmatpush1.bf16.msra.mxu0 %v1567_v20 }
  0x5a   :  { %929 = vmatprep.subr.bf16.mxu1 %v1572_v21  ;;  %1042 = vmatprep.subr.bf16.mxu0 %v1575_v22 }
  0x5d   :  { %930 = vmatpush1.bf16.msra.mxu1 %v1570_v23  ;;  %1043 = vmatpush1.bf16.msra.mxu0 %v1573_v24 }
  0xf2   :  { %v215_v25 = vpop.f32.mrb[0].mxu0  ;;  %v328_v26 = vpop.f32.mrb[0].mxu1 }
  0xf3   :  { %v409_v27 = vmax.f32 %v328_v26, 0.0  ;;  %v217_v28 = vpop.f32.mrb[1].mxu0  ;;  %v330_v29 = vpop.f32.mrb[1].mxu1  ;;  %v407_v33 = vmax.f32 %v215_v25, 0.0 }
  0xf4   :  { %v410_v30 = vmax.f32 %v330_v29, 0.0  ;;  %v219_v31 = vpop.f32.mrb[2].mxu0  ;;  %v332_v32 = vpop.f32.mrb[2].mxu1  ;;  %v408_v38 = vmax.f32 %v217_v28, 0.0 }
  0xf5   :  { %v411_v34 = vmax.f32 %v219_v31, 0.0  ;;  %v413_v35 = vmax.f32 %v332_v32, 0.0  ;;  %v221_v36 = vpop.f32.mrb[3].mxu0  ;;  %v334_v37 = vpop.f32.mrb[3].mxu1 }
  0xf6   :  { %v412_v39 = vmax.f32 %v221_v36, 0.0  ;;  %v414_v40 = vmax.f32 %v334_v37, 0.0 }
  0xf7   :  { %v471_v41 = vpack.c.bf16 %v411_v34, %v407_v33  ;;  %v473_v42 = vpack.c.bf16 %v413_v35, %v409_v27 }
  0xf8   :  { %v472_v43 = vpack.c.bf16 %v412_v39, %v408_v38  ;;  %v474_v44 = vpack.c.bf16 %v414_v40, %v410_v30 }
  0xfa   :  { %v225_v45 = vpop.f32.mrb[4].mxu0  ;;  %v338_v46 = vpop.f32.mrb[4].mxu1  ;;  %931 = vmatprep.mubr.bf16.mxu1 %v472_v43  ;;  %1044 = vmatprep.mubr.bf16.mxu0 %v474_v44 }
  0xfb   :  { %v417_v47 = vmax.f32 %v338_v46, 0.0  ;;  %v227_v48 = vpop.f32.mrb[5].mxu0  ;;  %v340_v49 = vpop.f32.mrb[5].mxu1  ;;  %932 = vmatmul.mubr.bf16.vlgmr.msra.gmra.mrb[32].mxu1 %v471_v41  ;;  %1045 = vmatmul.mubr.bf16.vlgmr.msra.gmra.mrb[32].mxu0 %v473_v42  ;;  %v415_v53 = vmax.f32 %v225_v45, 0.0 }
  0xfc   :  { %v418_v50 = vmax.f32 %v340_v49, 0.0  ;;  %v229_v51 = vpop.f32.mrb[6].mxu0  ;;  %v342_v52 = vpop.f32.mrb[6].mxu1  ;;  %v416_v58 = vmax.f32 %v227_v48, 0.0 }
  0xfd   :  { %v419_v54 = vmax.f32 %v229_v51, 0.0  ;;  %v421_v55 = vmax.f32 %v342_v52, 0.0  ;;  %v231_v56 = vpop.f32.mrb[7].mxu0  ;;  %v344_v57 = vpop.f32.mrb[7].mxu1 }
  0xfe   :  { %v420_v59 = vmax.f32 %v231_v56, 0.0  ;;  %v422_v60 = vmax.f32 %v344_v57, 0.0 }
  0xff   :  { %v475_v61 = vpack.c.bf16 %v419_v54, %v415_v53  ;;  %v477_v62 = vpack.c.bf16 %v421_v55, %v417_v47 }
 0x100   :  { %v476_v63 = vpack.c.bf16 %v420_v59, %v416_v58  ;;  %v478_v0 = vpack.c.bf16 %v422_v60, %v418_v50 }
 0x102   :  { %v235_v2 = vpop.f32.mrb[8].mxu0  ;;  %v348_v3 = vpop.f32.mrb[8].mxu1  ;;  %941 = vmatprep.mubr.bf16.mxu1 %v476_v63  ;;  %1054 = vmatprep.mubr.bf16.mxu0 %v478_v0 }
 0x103   :  { %v425_v4 = vmax.f32 %v348_v3, 0.0  ;;  %v237_v5 = vpop.f32.mrb[9].mxu0  ;;  %v350_v6 = vpop.f32.mrb[9].mxu1  ;;  %942 = vmatmul.mubr.bf16.gmra.mrb[36].mxu1 %v475_v61  ;;  %1055 = vmatmul.mubr.bf16.gmra.mrb[36].mxu0 %v477_v62  ;;  %v423_v10 = vmax.f32 %v235_v2, 0.0 }
 0x104   :  { %v426_v7 = vmax.f32 %v350_v6, 0.0  ;;  %v239_v8 = vpop.f32.mrb[10].mxu0  ;;  %v352_v9 = vpop.f32.mrb[10].mxu1  ;;  %v424_v15 = vmax.f32 %v237_v5, 0.0 }
 0x105   :  { %v427_v11 = vmax.f32 %v239_v8, 0.0  ;;  %v429_v12 = vmax.f32 %v352_v9, 0.0  ;;  %v241_v13 = vpop.f32.mrb[11].mxu0  ;;  %v354_v14 = vpop.f32.mrb[11].mxu1 }
 0x106   :  { %v428_v16 = vmax.f32 %v241_v13, 0.0  ;;  %v430_v17 = vmax.f32 %v354_v14, 0.0 }
 0x107   :  { %v479_v1 = vpack.c.bf16 %v427_v11, %v423_v10  ;;  %v481_v18 = vpack.c.bf16 %v429_v12, %v425_v4 }
 0x108   :  { %v480_v19 = vpack.c.bf16 %v428_v16, %v424_v15  ;;  %v482_v20 = vpack.c.bf16 %v430_v17, %v426_v7 }
 0x10a   :  { %v245_v21 = vpop.f32.mrb[12].mxu0  ;;  %v358_v22 = vpop.f32.mrb[12].mxu1  ;;  %951 = vmatprep.mubr.bf16.mxu1 %v480_v19  ;;  %1064 = vmatprep.mubr.bf16.mxu0 %v482_v20 }
 0x10b   :  { %v433_v23 = vmax.f32 %v358_v22, 0.0  ;;  %v247_v24 = vpop.f32.mrb[13].mxu0  ;;  %v360_v25 = vpop.f32.mrb[13].mxu1  ;;  %952 = vmatmul.mubr.bf16.gmra.mrb[40].mxu1 %v479_v1  ;;  %1065 = vmatmul.mubr.bf16.gmra.mrb[40].mxu0 %v481_v18  ;;  %v431_v29 = vmax.f32 %v245_v21, 0.0 }
 0x10c   :  { %v434_v26 = vmax.f32 %v360_v25, 0.0  ;;  %v249_v27 = vpop.f32.mrb[14].mxu0  ;;  %v362_v28 = vpop.f32.mrb[14].mxu1  ;;  %v432_v34 = vmax.f32 %v247_v24, 0.0 }
 0x10d   :  { %v435_v30 = vmax.f32 %v249_v27, 0.0  ;;  %v437_v31 = vmax.f32 %v362_v28, 0.0  ;;  %v251_v32 = vpop.f32.mrb[15].mxu0  ;;  %v364_v33 = vpop.f32.mrb[15].mxu1 }
 0x10e   :  { %v436_v35 = vmax.f32 %v251_v32, 0.0  ;;  %v438_v36 = vmax.f32 %v364_v33, 0.0 }
 0x10f   :  { %v483_v37 = vpack.c.bf16 %v435_v30, %v431_v29  ;;  %v485_v38 = vpack.c.bf16 %v437_v31, %v433_v23 }
 0x110   :  { %v484_v39 = vpack.c.bf16 %v436_v35, %v432_v34  ;;  %v486_v40 = vpack.c.bf16 %v438_v36, %v434_v26 }
 0x112   :  { %v255_v41 = vpop.f32.mrb[16].mxu0  ;;  %v368_v42 = vpop.f32.mrb[16].mxu1  ;;  %961 = vmatprep.mubr.bf16.mxu1 %v484_v39  ;;  %1074 = vmatprep.mubr.bf16.mxu0 %v486_v40 }
 0x113   :  { %v441_v43 = vmax.f32 %v368_v42, 0.0  ;;  %v257_v44 = vpop.f32.mrb[17].mxu0  ;;  %v370_v45 = vpop.f32.mrb[17].mxu1  ;;  %962 = vmatmul.mubr.bf16.gmra.mrb[44].mxu1 %v483_v37  ;;  %1075 = vmatmul.mubr.bf16.gmra.mrb[44].mxu0 %v485_v38  ;;  %v439_v49 = vmax.f32 %v255_v41, 0.0 }
 0x114   :  { %v442_v46 = vmax.f32 %v370_v45, 0.0  ;;  %v259_v47 = vpop.f32.mrb[18].mxu0  ;;  %v372_v48 = vpop.f32.mrb[18].mxu1  ;;  %v440_v54 = vmax.f32 %v257_v44, 0.0 }
 0x115   :  { %v443_v50 = vmax.f32 %v259_v47, 0.0  ;;  %v445_v51 = vmax.f32 %v372_v48, 0.0  ;;  %v261_v52 = vpop.f32.mrb[19].mxu0  ;;  %v374_v53 = vpop.f32.mrb[19].mxu1 }
 0x116   :  { %v444_v55 = vmax.f32 %v261_v52, 0.0  ;;  %v446_v56 = vmax.f32 %v374_v53, 0.0 }
 0x117   :  { %v487_v57 = vpack.c.bf16 %v443_v50, %v439_v49  ;;  %v489_v58 = vpack.c.bf16 %v445_v51, %v441_v43 }
 0x118   :  { %v488_v59 = vpack.c.bf16 %v444_v55, %v440_v54  ;;  %v490_v60 = vpack.c.bf16 %v446_v56, %v442_v46 }
 0x11a   :  { %v265_v61 = vpop.f32.mrb[20].mxu0  ;;  %v378_v62 = vpop.f32.mrb[20].mxu1  ;;  %971 = vmatprep.mubr.bf16.mxu1 %v488_v59  ;;  %1084 = vmatprep.mubr.bf16.mxu0 %v490_v60  ;;  %v567_v60 = vld [vmem:[%s1880_s3] sm:$0x3] }
 0x11b   :  { %v449_v63 = vmax.f32 %v378_v62, 0.0  ;;  %v267_v0 = vpop.f32.mrb[21].mxu0  ;;  %v380_v2 = vpop.f32.mrb[21].mxu1  ;;  %972 = vmatmul.mubr.bf16.gmra.mrb[48].mxu1 %v487_v57  ;;  %1085 = vmatmul.mubr.bf16.gmra.mrb[48].mxu0 %v489_v58  ;;  %v447_v6 = vmax.f32 %v265_v61, 0.0  ;;  %v569_v57 = vlaneseq }
 0x11c   :  { %v450_v3 = vmax.f32 %v380_v2, 0.0  ;;  %v269_v4 = vpop.f32.mrb[22].mxu0  ;;  %v382_v5 = vpop.f32.mrb[22].mxu1  ;;  %v448_v11 = vmax.f32 %v267_v0, 0.0 }
 0x11d   :  { %v451_v7 = vmax.f32 %v269_v4, 0.0  ;;  %v453_v8 = vmax.f32 %v382_v5, 0.0  ;;  %v271_v9 = vpop.f32.mrb[23].mxu0  ;;  %v384_v10 = vpop.f32.mrb[23].mxu1  ;;  %v570_v58 = vshrl.u32 %v569_v57, 7 }
 0x11e   :  { %v452_v12 = vmax.f32 %v271_v9, 0.0  ;;  %v454_v13 = vmax.f32 %v384_v10, 0.0 }
 0x11f   :  { %v491_v14 = vpack.c.bf16 %v451_v7, %v447_v6  ;;  %v493_v15 = vpack.c.bf16 %v453_v8, %v449_v63  ;;  %v571_v59 = vsub.s32 0, %v570_v58  ;;  %v575_v61 = vsub.s32 1, %v570_v58 }
 0x120   :  { %v492_v16 = vpack.c.bf16 %v452_v12, %v448_v11  ;;  %v494_v17 = vpack.c.bf16 %v454_v13, %v450_v3  ;;  %v1157_v3 = vld [vmem:[%s1881_s4] sm:$0x3] }
 0x121   :  { %v1738_v62 = vrot.slane %v567_v60, %v571_v59  ;;  %v1740_v63 = vrot.slane %v567_v60, %v575_v61  ;;  %v1748_v12 = vrot.slane %v1157_v3, %v571_v59 }
 0x122   :  { %v275_v1 = vpop.f32.mrb[24].mxu0  ;;  %v388_v18 = vpop.f32.mrb[24].mxu1  ;;  %981 = vmatprep.mubr.bf16.mxu1 %v492_v16  ;;  %1094 = vmatprep.mubr.bf16.mxu0 %v494_v17  ;;  %v1751_v17 = vrot.slane %v1157_v3, %v575_v61 }
 0x123   :  { %v457_v19 = vmax.f32 %v388_v18, 0.0  ;;  %v277_v20 = vpop.f32.mrb[25].mxu0  ;;  %v390_v21 = vpop.f32.mrb[25].mxu1  ;;  %982 = vmatmul.mubr.bf16.gmra.mrb[52].mxu1 %v491_v14  ;;  %1095 = vmatmul.mubr.bf16.gmra.mrb[52].mxu0 %v493_v15  ;;  %v455_v25 = vmax.f32 %v275_v1, 0.0 }
 0x124   :  { %v458_v22 = vmax.f32 %v390_v21, 0.0  ;;  %v279_v23 = vpop.f32.mrb[26].mxu0  ;;  %v392_v24 = vpop.f32.mrb[26].mxu1  ;;  %v456_v30 = vmax.f32 %v277_v20, 0.0 }
 0x125   :  { %v459_v26 = vmax.f32 %v279_v23, 0.0  ;;  %v461_v27 = vmax.f32 %v392_v24, 0.0  ;;  %v281_v28 = vpop.f32.mrb[27].mxu0  ;;  %v394_v29 = vpop.f32.mrb[27].mxu1 }
 0x126   :  { %v460_v31 = vmax.f32 %v281_v28, 0.0  ;;  %v462_v32 = vmax.f32 %v394_v29, 0.0 }
 0x127   :  { %v495_v33 = vpack.c.bf16 %v459_v26, %v455_v25  ;;  %v497_v34 = vpack.c.bf16 %v461_v27, %v457_v19 }
 0x128   :  { %v496_v35 = vpack.c.bf16 %v460_v31, %v456_v30  ;;  %v498_v36 = vpack.c.bf16 %v462_v32, %v458_v22 }
 0x12a   :  { %v285_v37 = vpop.f32.mrb[28].mxu0  ;;  %v398_v38 = vpop.f32.mrb[28].mxu1  ;;  %991 = vmatprep.mubr.bf16.mxu1 %v496_v35  ;;  %1104 = vmatprep.mubr.bf16.mxu0 %v498_v36 }
 0x12b   :  { %v465_v39 = vmax.f32 %v398_v38, 0.0  ;;  %v287_v40 = vpop.f32.mrb[29].mxu0  ;;  %v400_v41 = vpop.f32.mrb[29].mxu1  ;;  %992 = vmatmul.mubr.bf16.gmra.mrb[56].mxu1 %v495_v33  ;;  %1105 = vmatmul.mubr.bf16.gmra.mrb[56].mxu0 %v497_v34  ;;  %v463_v45 = vmax.f32 %v285_v37, 0.0 }
 0x12c   :  { %v466_v42 = vmax.f32 %v400_v41, 0.0  ;;  %v289_v43 = vpop.f32.mrb[30].mxu0  ;;  %v402_v44 = vpop.f32.mrb[30].mxu1  ;;  %v464_v50 = vmax.f32 %v287_v40, 0.0 }
 0x12d   :  { %v467_v46 = vmax.f32 %v289_v43, 0.0  ;;  %v469_v47 = vmax.f32 %v402_v44, 0.0  ;;  %v291_v48 = vpop.f32.mrb[31].mxu0  ;;  %v404_v49 = vpop.f32.mrb[31].mxu1 }
 0x12e   :  { %v468_v51 = vmax.f32 %v291_v48, 0.0  ;;  %v470_v52 = vmax.f32 %v404_v49, 0.0 }
 0x12f   :  { %v499_v53 = vpack.c.bf16 %v467_v46, %v463_v45  ;;  %v501_v54 = vpack.c.bf16 %v469_v47, %v465_v39 }
 0x130   :  { %v500_v55 = vpack.c.bf16 %v468_v51, %v464_v50  ;;  %v502_v56 = vpack.c.bf16 %v470_v52, %v466_v42 }
 0x132   :  { %1001 = vmatprep.mubr.bf16.mxu1 %v500_v55  ;;  %1114 = vmatprep.mubr.bf16.mxu0 %v502_v56 }
 0x133   :  { %1002 = vmatmul.mubr.bf16.gmra.mrb[60].mxu1 %v499_v53  ;;  %1115 = vmatmul.mubr.bf16.gmra.mrb[60].mxu0 %v501_v54 }
 0x1ce   :  { %v933_v0 = vpop.f32.mrb[32].mxu1  ;;  %v1046_v2 = vpop.f32.mrb[32].mxu0 }
 0x1cf   :  { %v934_v4 = vadd.f32 %v933_v0, %v1738_v62  ;;  %v935_v5 = vpop.f32.mrb[33].mxu1  ;;  %v1048_v6 = vpop.f32.mrb[33].mxu0 }
 0x1d0   :  { %v936_v7 = vadd.f32 %v935_v5, %v1740_v63  ;;  %v937_v8 = vpop.f32.mrb[34].mxu1  ;;  %v1050_v9 = vpop.f32.mrb[34].mxu0 }
 0x1d1   :  { %v1047_v10 = vadd.f32 %v1046_v2, %v934_v4  ;;  %v938_v11 = vadd.f32 %v937_v8, %v1738_v62  ;;  %v939_v13 = vpop.f32.mrb[35].mxu1  ;;  %v1052_v14 = vpop.f32.mrb[35].mxu0 }
 0x1d2   :  { %v1049_v15 = vadd.f32 %v1048_v6, %v936_v7  ;;  %v940_v16 = vadd.f32 %v939_v13, %v1740_v63 }
 0x1d3   :  { %v1125_v1 = vmax.f32 %v1047_v10, 0.0  ;;  %v1051_v18 = vadd.f32 %v1050_v9, %v938_v11 }
 0x1d4   :  { %v1126_v19 = vmax.f32 %v1049_v15, 0.0  ;;  %v1053_v20 = vadd.f32 %v1052_v14, %v940_v16 }
 0x1d5   :  { %v1127_v21 = vmax.f32 %v1051_v18, 0.0  ;;  %v1169_v22 = vmul.f32 %v1748_v12, %v1125_v1 }
 0x1d6   :  { %v1128_v23 = vmax.f32 %v1053_v20, 0.0  ;;  %v943_v24 = vpop.f32.mrb[36].mxu1  ;;  %v1056_v25 = vpop.f32.mrb[36].mxu0  ;;  %v1170_v26 = vmul.f32 %v1751_v17, %v1126_v19 }
 0x1d7   :  { %v1171_v27 = vmul.f32 %v1748_v12, %v1127_v21  ;;  %v944_v28 = vadd.f32 %v943_v24, %v1738_v62  ;;  %v945_v29 = vpop.f32.mrb[37].mxu1  ;;  %v1058_v30 = vpop.f32.mrb[37].mxu0 }
 0x1d8   :  { %v1172_v31 = vmul.f32 %v1751_v17, %v1128_v23  ;;  %v946_v32 = vadd.f32 %v945_v29, %v1740_v63  ;;  %v947_v33 = vpop.f32.mrb[38].mxu1  ;;  %v1060_v34 = vpop.f32.mrb[38].mxu0  ;;  %v1201_v35 = vadd.f32 %v1170_v26, %v1169_v22 }
 0x1d9   :  { %v1057_v36 = vadd.f32 %v1056_v25, %v944_v28  ;;  %v948_v37 = vadd.f32 %v947_v33, %v1738_v62  ;;  %v949_v38 = vpop.f32.mrb[39].mxu1  ;;  %v1062_v39 = vpop.f32.mrb[39].mxu0 }
 0x1da   :  { %v1059_v40 = vadd.f32 %v1058_v30, %v946_v32  ;;  %v950_v41 = vadd.f32 %v949_v38, %v1740_v63  ;;  %1202 = vadd.xlane.f32.xlu0 %v1201_v35  ;;  %v1204_v42 = vadd.f32 %v1172_v31, %v1171_v27 }
 0x1db   :  { %v1129_v43 = vmax.f32 %v1057_v36, 0.0  ;;  %v1061_v44 = vadd.f32 %v1060_v34, %v948_v37 }
 0x1dc   :  { %v1130_v45 = vmax.f32 %v1059_v40, 0.0  ;;  %v1063_v46 = vadd.f32 %v1062_v39, %v950_v41 }
 0x1dd   :  { %v1131_v47 = vmax.f32 %v1061_v44, 0.0  ;;  %v1173_v48 = vmul.f32 %v1748_v12, %v1129_v43 }
 0x1de   :  { %v1132_v49 = vmax.f32 %v1063_v46, 0.0  ;;  %v953_v50 = vpop.f32.mrb[40].mxu1  ;;  %v1066_v51 = vpop.f32.mrb[40].mxu0  ;;  %1205 = vadd.xlane.f32.xlu0 %v1204_v42  ;;  %v1174_v52 = vmul.f32 %v1751_v17, %v1130_v45 }
 0x1df   :  { %v1175_v53 = vmul.f32 %v1748_v12, %v1131_v47  ;;  %v954_v54 = vadd.f32 %v953_v50, %v1738_v62  ;;  %v955_v55 = vpop.f32.mrb[41].mxu1  ;;  %v1068_v56 = vpop.f32.mrb[41].mxu0 }
 0x1e0   :  { %v1176_v57 = vmul.f32 %v1751_v17, %v1132_v49  ;;  %v956_v58 = vadd.f32 %v955_v55, %v1740_v63  ;;  %v957_v59 = vpop.f32.mrb[42].mxu1  ;;  %v1070_v60 = vpop.f32.mrb[42].mxu0  ;;  %v1207_v61 = vadd.f32 %v1174_v52, %v1173_v48 }
 0x1e1   :  { %v1067_v0 = vadd.f32 %v1066_v51, %v954_v54  ;;  %v958_v2 = vadd.f32 %v957_v59, %v1738_v62  ;;  %v959_v3 = vpop.f32.mrb[43].mxu1  ;;  %v1072_v4 = vpop.f32.mrb[43].mxu0 }
 0x1e2   :  { %v1069_v5 = vadd.f32 %v1068_v56, %v956_v58  ;;  %v960_v6 = vadd.f32 %v959_v3, %v1740_v63  ;;  %1208 = vadd.xlane.f32.xlu1 %v1207_v61  ;;  %v1210_v7 = vadd.f32 %v1176_v57, %v1175_v53 }
 0x1e3   :  { %v1133_v8 = vmax.f32 %v1067_v0, 0.0  ;;  %v1071_v9 = vadd.f32 %v1070_v60, %v958_v2 }
 0x1e4   :  { %v1134_v10 = vmax.f32 %v1069_v5, 0.0  ;;  %v1073_v11 = vadd.f32 %v1072_v4, %v960_v6 }
 0x1e5   :  { %v1177_v13 = vmul.f32 %v1748_v12, %v1133_v8  ;;  %v1135_v14 = vmax.f32 %v1071_v9, 0.0 }
 0x1e6   :  { %v1178_v15 = vmul.f32 %v1751_v17, %v1134_v10  ;;  %v1136_v16 = vmax.f32 %v1073_v11, 0.0  ;;  %v963_v1 = vpop.f32.mrb[44].mxu1  ;;  %v1076_v18 = vpop.f32.mrb[44].mxu0  ;;  %1211 = vadd.xlane.f32.xlu1 %v1210_v7 }
 0x1e7   :  { %v1179_v19 = vmul.f32 %v1748_v12, %v1135_v14  ;;  %v964_v20 = vadd.f32 %v963_v1, %v1738_v62  ;;  %v965_v21 = vpop.f32.mrb[45].mxu1  ;;  %v1078_v22 = vpop.f32.mrb[45].mxu0 }
 0x1e8   :  { %v1180_v23 = vmul.f32 %v1751_v17, %v1136_v16  ;;  %v966_v24 = vadd.f32 %v965_v21, %v1740_v63  ;;  %v967_v25 = vpop.f32.mrb[46].mxu1  ;;  %v1080_v26 = vpop.f32.mrb[46].mxu0  ;;  %v1213_v27 = vadd.f32 %v1178_v15, %v1177_v13 }
 0x1e9   :  { %v1077_v28 = vadd.f32 %v1076_v18, %v964_v20  ;;  %v968_v29 = vadd.f32 %v967_v25, %v1738_v62  ;;  %v969_v30 = vpop.f32.mrb[47].mxu1  ;;  %v1082_v31 = vpop.f32.mrb[47].mxu0 }
 0x1ea   :  { %v1079_v32 = vadd.f32 %v1078_v22, %v966_v24  ;;  %v970_v33 = vadd.f32 %v969_v30, %v1740_v63  ;;  %1214 = vadd.xlane.f32.xlu0 %v1213_v27  ;;  %v1216_v34 = vadd.f32 %v1180_v23, %v1179_v19 }
 0x1eb   :  { %v1137_v35 = vmax.f32 %v1077_v28, 0.0  ;;  %v1081_v36 = vadd.f32 %v1080_v26, %v968_v29 }
 0x1ec   :  { %v1138_v37 = vmax.f32 %v1079_v32, 0.0  ;;  %v1083_v38 = vadd.f32 %v1082_v31, %v970_v33  ;;  %1217 = vadd.xlane.f32.xlu1 %v1216_v34 }
 0x1ed   :  { %v1181_v39 = vmul.f32 %v1748_v12, %v1137_v35  ;;  %v1139_v40 = vmax.f32 %v1081_v36, 0.0 }
 0x1ee   :  { %v1182_v41 = vmul.f32 %v1751_v17, %v1138_v37  ;;  %v1140_v42 = vmax.f32 %v1083_v38, 0.0  ;;  %v973_v43 = vpop.f32.mrb[48].mxu1  ;;  %v1086_v44 = vpop.f32.mrb[48].mxu0 }
 0x1ef   :  { %v1183_v45 = vmul.f32 %v1748_v12, %v1139_v40  ;;  %v974_v46 = vadd.f32 %v973_v43, %v1738_v62  ;;  %v975_v47 = vpop.f32.mrb[49].mxu1  ;;  %v1088_v48 = vpop.f32.mrb[49].mxu0 }
 0x1f0   :  { %v1184_v49 = vmul.f32 %v1751_v17, %v1140_v42  ;;  %v976_v50 = vadd.f32 %v975_v47, %v1740_v63  ;;  %v977_v51 = vpop.f32.mrb[50].mxu1  ;;  %v1090_v52 = vpop.f32.mrb[50].mxu0  ;;  %v1219_v53 = vadd.f32 %v1182_v41, %v1181_v39 }
 0x1f1   :  { %v1087_v54 = vadd.f32 %v1086_v44, %v974_v46  ;;  %v978_v55 = vadd.f32 %v977_v51, %v1738_v62  ;;  %v979_v56 = vpop.f32.mrb[51].mxu1  ;;  %v1092_v57 = vpop.f32.mrb[51].mxu0 }
 0x1f2   :  { %v1089_v58 = vadd.f32 %v1088_v48, %v976_v50  ;;  %v980_v59 = vadd.f32 %v979_v56, %v1740_v63  ;;  %1220 = vadd.xlane.f32.xlu0 %v1219_v53  ;;  %v1222_v60 = vadd.f32 %v1184_v49, %v1183_v45 }
 0x1f3   :  { %v1141_v61 = vmax.f32 %v1087_v54, 0.0  ;;  %v1091_v0 = vadd.f32 %v1090_v52, %v978_v55 }
 0x1f4   :  { %v1142_v2 = vmax.f32 %v1089_v58, 0.0  ;;  %v1093_v3 = vadd.f32 %v1092_v57, %v980_v59  ;;  %1223 = vadd.xlane.f32.xlu1 %v1222_v60 }
 0x1f5   :  { %v1185_v4 = vmul.f32 %v1748_v12, %v1141_v61  ;;  %v1143_v5 = vmax.f32 %v1091_v0, 0.0 }
 0x1f6   :  { %v1186_v6 = vmul.f32 %v1751_v17, %v1142_v2  ;;  %v1144_v7 = vmax.f32 %v1093_v3, 0.0  ;;  %v983_v8 = vpop.f32.mrb[52].mxu1  ;;  %v1096_v9 = vpop.f32.mrb[52].mxu0 }
 0x1f7   :  { %v1187_v10 = vmul.f32 %v1748_v12, %v1143_v5  ;;  %v984_v11 = vadd.f32 %v983_v8, %v1738_v62  ;;  %v985_v13 = vpop.f32.mrb[53].mxu1  ;;  %v1098_v14 = vpop.f32.mrb[53].mxu0 }
 0x1f8   :  { %v1188_v15 = vmul.f32 %v1751_v17, %v1144_v7  ;;  %v986_v16 = vadd.f32 %v985_v13, %v1740_v63  ;;  %v987_v1 = vpop.f32.mrb[54].mxu1  ;;  %v1100_v18 = vpop.f32.mrb[54].mxu0  ;;  %v1225_v19 = vadd.f32 %v1186_v6, %v1185_v4 }
 0x1f9   :  { %v1097_v20 = vadd.f32 %v1096_v9, %v984_v11  ;;  %v988_v21 = vadd.f32 %v987_v1, %v1738_v62  ;;  %v989_v22 = vpop.f32.mrb[55].mxu1  ;;  %v1102_v23 = vpop.f32.mrb[55].mxu0 }
 0x1fa   :  { %v1099_v24 = vadd.f32 %v1098_v14, %v986_v16  ;;  %v990_v25 = vadd.f32 %v989_v22, %v1740_v63  ;;  %1226 = vadd.xlane.f32.xlu0 %v1225_v19  ;;  %v1228_v26 = vadd.f32 %v1188_v15, %v1187_v10 }
 0x1fb   :  { %v1145_v27 = vmax.f32 %v1097_v20, 0.0  ;;  %v1101_v28 = vadd.f32 %v1100_v18, %v988_v21 }
 0x1fc   :  { %v1146_v29 = vmax.f32 %v1099_v24, 0.0  ;;  %v1103_v30 = vadd.f32 %v1102_v23, %v990_v25  ;;  %1229 = vadd.xlane.f32.xlu1 %v1228_v26 }
 0x1fd   :  { %v1189_v31 = vmul.f32 %v1748_v12, %v1145_v27  ;;  %v1147_v32 = vmax.f32 %v1101_v28, 0.0 }
 0x1fe   :  { %v1190_v33 = vmul.f32 %v1751_v17, %v1146_v29  ;;  %v1148_v34 = vmax.f32 %v1103_v30, 0.0  ;;  %v993_v35 = vpop.f32.mrb[56].mxu1  ;;  %v1106_v36 = vpop.f32.mrb[56].mxu0  ;;  %v1390_v29 = vld [vmem:[#allocation2] ss:$0 sm:$0xff] }
 0x1ff   :  { %v1191_v37 = vmul.f32 %v1748_v12, %v1147_v32  ;;  %v994_v38 = vadd.f32 %v993_v35, %v1738_v62  ;;  %v995_v39 = vpop.f32.mrb[57].mxu1  ;;  %v1108_v40 = vpop.f32.mrb[57].mxu0 }
 0x200   :  { %v1192_v41 = vmul.f32 %v1751_v17, %v1148_v34  ;;  %v996_v42 = vadd.f32 %v995_v39, %v1740_v63  ;;  %v997_v43 = vpop.f32.mrb[58].mxu1  ;;  %v1110_v44 = vpop.f32.mrb[58].mxu0  ;;  %v1231_v45 = vadd.f32 %v1190_v33, %v1189_v31 }
 0x201   :  { %v1107_v46 = vadd.f32 %v1106_v36, %v994_v38  ;;  %v998_v47 = vadd.f32 %v997_v43, %v1738_v62  ;;  %v999_v48 = vpop.f32.mrb[59].mxu1  ;;  %v1112_v49 = vpop.f32.mrb[59].mxu0 }
 0x202   :  { %v1109_v50 = vadd.f32 %v1108_v40, %v996_v42  ;;  %v1000_v51 = vadd.f32 %v999_v48, %v1740_v63  ;;  %1232 = vadd.xlane.f32.xlu0 %v1231_v45  ;;  %v1234_v52 = vadd.f32 %v1192_v41, %v1191_v37 }
 0x203   :  { %v1149_v53 = vmax.f32 %v1107_v46, 0.0  ;;  %v1111_v54 = vadd.f32 %v1110_v44, %v998_v47 }
 0x204   :  { %v1150_v55 = vmax.f32 %v1109_v50, 0.0  ;;  %v1113_v56 = vadd.f32 %v1112_v49, %v1000_v51  ;;  %1235 = vadd.xlane.f32.xlu1 %v1234_v52 }
 0x205   :  { %v1193_v57 = vmul.f32 %v1748_v12, %v1149_v53  ;;  %v1151_v58 = vmax.f32 %v1111_v54, 0.0 }
 0x206   :  { %v1194_v59 = vmul.f32 %v1751_v17, %v1150_v55  ;;  %v1152_v60 = vmax.f32 %v1113_v56, 0.0  ;;  %v1003_v61 = vpop.f32.mrb[60].mxu1  ;;  %v1116_v0 = vpop.f32.mrb[60].mxu0 }
 0x207   :  { %v1195_v2 = vmul.f32 %v1748_v12, %v1151_v58  ;;  %v1004_v3 = vadd.f32 %v1003_v61, %v1738_v62  ;;  %v1005_v4 = vpop.f32.mrb[61].mxu1  ;;  %v1118_v5 = vpop.f32.mrb[61].mxu0 }
 0x208   :  { %v1196_v6 = vmul.f32 %v1751_v17, %v1152_v60  ;;  %v1006_v7 = vadd.f32 %v1005_v4, %v1740_v63  ;;  %v1007_v8 = vpop.f32.mrb[62].mxu1  ;;  %v1120_v9 = vpop.f32.mrb[62].mxu0  ;;  %v1237_v10 = vadd.f32 %v1194_v59, %v1193_v57 }
 0x209   :  { %v1117_v11 = vadd.f32 %v1116_v0, %v1004_v3  ;;  %v1008_v13 = vadd.f32 %v1007_v8, %v1738_v62  ;;  %v1009_v14 = vpop.f32.mrb[63].mxu1  ;;  %v1122_v15 = vpop.f32.mrb[63].mxu0 }
 0x20a   :  { %v1119_v16 = vadd.f32 %v1118_v5, %v1006_v7  ;;  %v1010_v1 = vadd.f32 %v1009_v14, %v1740_v63  ;;  %1238 = vadd.xlane.f32.xlu0 %v1237_v10  ;;  %v1240_v18 = vadd.f32 %v1196_v6, %v1195_v2 }
 0x20b   :  { %v1153_v19 = vmax.f32 %v1117_v11, 0.0  ;;  %v1121_v20 = vadd.f32 %v1120_v9, %v1008_v13 }
 0x20c   :  { %v1154_v21 = vmax.f32 %v1119_v16, 0.0  ;;  %v1123_v22 = vadd.f32 %v1122_v15, %v1010_v1  ;;  %1241 = vadd.xlane.f32.xlu1 %v1240_v18 }
 0x20d   :  { %v1197_v23 = vmul.f32 %v1748_v12, %v1153_v19  ;;  %v1155_v24 = vmax.f32 %v1121_v20, 0.0 }
 0x20e   :  { %v1198_v25 = vmul.f32 %v1751_v17, %v1154_v21  ;;  %v1156_v26 = vmax.f32 %v1123_v22, 0.0 }
 0x20f   :  { %v1199_v62 = vmul.f32 %v1748_v12, %v1155_v24 }
 0x210   :  { %v1200_v27 = vmul.f32 %v1751_v17, %v1156_v26  ;;  %v1243_v28 = vadd.f32 %v1198_v25, %v1197_v23 }
 0x212   :  { %1244 = vadd.xlane.f32.xlu0 %v1243_v28  ;;  %v1246_v63 = vadd.f32 %v1200_v27, %v1199_v62 }
 0x214   :  { %1247 = vadd.xlane.f32.xlu1 %v1246_v63 }
 0x267   :  { %v1203_v30 = vpop.xlane.xlu0 %1202 }
 0x268   :  { %v1256_v31 = vadd.f32 %v1390_v29, %v1203_v30 }
 0x26a   :  { %1273 = vst.msk [vmem:[%s1883_s6] sm:$0xff] %vm1272_vm3, %v1256_v31 }
 0x26b   :  { %v1206_v32 = vpop.xlane.xlu0 %1205 }
 0x26c   :  { %v1257_v33 = vadd.f32 %v1390_v29, %v1206_v32 }
 0x26e   :  { %1274 = vst.msk [vmem:[%s1883_s6 + $0x8] sm:$0xff] %vm1272_vm3, %v1257_v33 }
 0x26f   :  { %v1209_v12 = vpop.xlane.xlu1 %1208 }
 0x270   :  { %v1258_v17 = vadd.f32 %v1390_v29, %v1209_v12 }
 0x272   :  { %1275 = vst.msk [vmem:[%s1883_s6 + $0x10] sm:$0xff] %vm1272_vm3, %v1258_v17 }
 0x273   :  { %v1212_v34 = vpop.xlane.xlu1 %1211 }
 0x274   :  { %v1259_v35 = vadd.f32 %v1390_v29, %v1212_v34 }
 0x276   :  { %1276 = vst.msk [vmem:[%s1883_s6 + $0x18] sm:$0xff] %vm1272_vm3, %v1259_v35 }
 0x277   :  { %v1215_v36 = vpop.xlane.xlu0 %1214 }
 0x278   :  { %v1260_v37 = vadd.f32 %v1390_v29, %v1215_v36 }
 0x279   :  { %v1218_v38 = vpop.xlane.xlu1 %1217 }
 0x27a   :  { %1277 = vst.msk [vmem:[%s1883_s6 + $0x20] sm:$0xff] %vm1272_vm3, %v1260_v37  ;;  %v1261_v39 = vadd.f32 %v1390_v29, %v1218_v38 }
 0x27c   :  { %1278 = vst.msk [vmem:[%s1883_s6 + $0x28] sm:$0xff] %vm1272_vm3, %v1261_v39 }
 0x27f   :  { %v1221_v40 = vpop.xlane.xlu0 %1220 }
 0x280   :  { %v1262_v41 = vadd.f32 %v1390_v29, %v1221_v40 }
 0x281   :  { %v1224_v42 = vpop.xlane.xlu1 %1223 }
 0x282   :  { %1279 = vst.msk [vmem:[%s1883_s6 + $0x30] sm:$0xff] %vm1272_vm3, %v1262_v41  ;;  %v1263_v43 = vadd.f32 %v1390_v29, %v1224_v42 }
 0x284   :  { %1280 = vst.msk [vmem:[%s1883_s6 + $0x38] sm:$0xff] %vm1272_vm3, %v1263_v43 }
 0x287   :  { %v1227_v44 = vpop.xlane.xlu0 %1226 }
 0x288   :  { %v1264_v45 = vadd.f32 %v1390_v29, %v1227_v44 }
 0x289   :  { %v1230_v46 = vpop.xlane.xlu1 %1229 }
 0x28a   :  { %1281 = vst.msk [vmem:[%s1883_s6 + $0x40] sm:$0xff] %vm1272_vm3, %v1264_v45  ;;  %v1265_v47 = vadd.f32 %v1390_v29, %v1230_v46 }
 0x28c   :  { %1282 = vst.msk [vmem:[%s1883_s6 + $0x48] sm:$0xff] %vm1272_vm3, %v1265_v47 }
 0x28f   :  { %v1233_v48 = vpop.xlane.xlu0 %1232 }
 0x290   :  { %v1266_v49 = vadd.f32 %v1390_v29, %v1233_v48 }
 0x291   :  { %v1236_v50 = vpop.xlane.xlu1 %1235 }
 0x292   :  { %1283 = vst.msk [vmem:[%s1883_s6 + $0x50] sm:$0xff] %vm1272_vm3, %v1266_v49  ;;  %v1267_v51 = vadd.f32 %v1390_v29, %v1236_v50 }
 0x294   :  { %1284 = vst.msk [vmem:[%s1883_s6 + $0x58] sm:$0xff] %vm1272_vm3, %v1267_v51 }
 0x297   :  { %v1239_v52 = vpop.xlane.xlu0 %1238 }
 0x298   :  { %v1268_v53 = vadd.f32 %v1390_v29, %v1239_v52 }
 0x299   :  { %v1242_v54 = vpop.xlane.xlu1 %1241 }
 0x29a   :  { %1285 = vst.msk [vmem:[%s1883_s6 + $0x60] sm:$0xff] %vm1272_vm3, %v1268_v53  ;;  %v1269_v55 = vadd.f32 %v1390_v29, %v1242_v54 }
 0x29c   :  { %1286 = vst.msk [vmem:[%s1883_s6 + $0x68] sm:$0xff] %vm1272_vm3, %v1269_v55 }
 0x29f   :  { %v1245_v56 = vpop.xlane.xlu0 %1244 }
 0x2a0   :  { %v1270_v57 = vadd.f32 %v1390_v29, %v1245_v56 }
 0x2a1   :  { %v1248_v58 = vpop.xlane.xlu1 %1247 }
 0x2a2   :  { %1287 = vst.msk [vmem:[%s1883_s6 + $0x70] sm:$0xff] %vm1272_vm3, %v1270_v57  ;;  %v1271_v59 = vadd.f32 %v1390_v29, %v1248_v58 }
 0x2a4   :  { %1288 = vst.msk [vmem:[%s1883_s6 + $0x78] sm:$0xff] %vm1272_vm3, %v1271_v59 }
 0x2a5   :  { %1293 = vsyncpa [#allocation4], 1 }

</bundles_post_ra>
